<compile_context>
chip_gen: v7x
topology: tpu7x:2x2x1
jax: 0.10.0
libtpu: 0.0.40
codegen_flags: <defaults>
</compile_context>

<pallas_src>
import functools
import math

import jax
import jax.numpy as jnp
from jax.experimental import pallas as pl
from jax.experimental.pallas import tpu as pltpu


def _round_up(a, b):
    return ((a + b - 1) // b) * b


def _arcface_kernel(xn_ref, w_ref, lab_ref, o_ref, acc_ref, wsq_ref, *,
                    s, cos_m, sin_m, th, mm):
    # Grid bookkeeping hoisted out of any pl.when bodies.
    j = pl.program_id(1)                 # class-tile index
    k = pl.program_id(2)                 # embedding (reduction) tile index
    nk = pl.num_programs(2)

    @pl.when(k == 0)
    def _init():
        acc_ref[...] = jnp.zeros_like(acc_ref)
        wsq_ref[...] = jnp.zeros_like(wsq_ref)

    x = xn_ref[...]          # (tm, tk) rows already L2-normalized
    w = w_ref[...]           # (tn, tk) PyTorch layout, un-normalized

    # x @ W.T on the MXU with f32 accumulation; contracting the last dims of
    # both operands avoids any materialized transpose of the weight.
    acc_ref[...] += jax.lax.dot_general(
        x, w, (((1,), (1,)), ((), ())), preferred_element_type=jnp.float32)

    # Accumulate per-class squared norms of W from the tile already in VMEM
    # (MXU trick keeps the result lane-dense: ones[8,tk] @ (W*W)[tn,tk].T).
    wf = w.astype(jnp.float32)
    ones = jnp.ones((8, w.shape[-1]), jnp.float32)
    wsq_ref[...] += jax.lax.dot_general(
        ones, wf * wf, (((1,), (1,)), ((), ())),
        preferred_element_type=jnp.float32)

    @pl.when(k == nk - 1)
    def _finalize():
        # 1 / max(||w_row||, 1e-12), matching F.normalize's eps handling.
        inv_w = jax.lax.rsqrt(jnp.maximum(wsq_ref[0:1, :], 1e-24))   # (1, tn)
        cosine = acc_ref[...] * inv_w                                # (tm, tn) f32
        sine = jnp.sqrt(jnp.clip(1.0 - cosine * cosine, 0.0, 1.0))
        phi = cosine * cos_m - sine * sin_m
        phi = jnp.where(cosine > th, phi, cosine - mm)

        # Apply the margin only at each row's label column (the PyTorch
        # in-place scatter expressed as a mask).
        tn = cosine.shape[1]
        col = jax.lax.broadcasted_iota(jnp.int32, cosine.shape, 1) + j * tn
        is_target = col == lab_ref[...]                              # (tm, tn)

        o_ref[...] = (jnp.where(is_target, phi, cosine) * s).astype(o_ref.dtype)


def arcface_forward(x, weight, label, *, s=30.0, m=0.5,
                    tm=128, tn=512, tk=512):
    """ArcFace forward: x [batch, emb], weight [class_num, emb] (PyTorch layout),
    label [batch] int. Returns [batch, class_num] logits (already scaled by s)."""
    batch, emb = x.shape
    cls, emb_w = weight.shape
    assert emb == emb_w, "embedding size mismatch"

    cos_m = math.cos(m)
    sin_m = math.sin(m)
    th = math.cos(math.pi - m)
    mm = math.sin(math.pi - m) * m

    # Row-normalize the (small) activations once in the wrapper; the (large)
    # weight is normalized inside the kernel so it is streamed from HBM once.
    xf = x.astype(jnp.float32)
    x_hat = (xf * jax.lax.rsqrt(
        jnp.maximum(jnp.sum(xf * xf, axis=1, keepdims=True), 1e-24))
             ).astype(x.dtype)

    # Tile sizes: sublane dim multiple of 8, lane dims multiples of 128.
    tm = max(8, min(_round_up(tm, 8), _round_up(batch, 8)))
    tn = max(128, min(_round_up(tn, 128), _round_up(cls, 128)))
    tk = max(128, min(_round_up(tk, 128), _round_up(emb, 128)))

    mp = _round_up(batch, tm)
    np_ = _round_up(cls, tn)
    kp = _round_up(emb, tk)

    x_p = jnp.pad(x_hat, ((0, mp - batch), (0, kp - emb)))
    w_p = jnp.pad(weight, ((0, np_ - cls), (0, kp - emb)))
    lab_p = jnp.pad(label.astype(jnp.int32).reshape(batch, 1),
                    ((0, mp - batch), (0, 0)), constant_values=-1)

    grid = (mp // tm, np_ // tn, kp // tk)

    kernel = functools.partial(_arcface_kernel, s=float(s), cos_m=cos_m,
                               sin_m=sin_m, th=th, mm=mm)

    out_p = pl.pallas_call(
        kernel,
        out_shape=jax.ShapeDtypeStruct((mp, np_), x.dtype),
        grid_spec=pltpu.PrefetchScalarGridSpec(
            num_scalar_prefetch=0,
            grid=grid,
            in_specs=[
                pl.BlockSpec((tm, tk), lambda i, j, k: (i, k)),   # x_hat
                pl.BlockSpec((tn, tk), lambda i, j, k: (j, k)),   # weight (no transpose)
                pl.BlockSpec((tm, 1), lambda i, j, k: (i, 0)),    # labels
            ],
            out_specs=pl.BlockSpec((tm, tn), lambda i, j, k: (i, j)),
            scratch_shapes=[
                pltpu.VMEM((tm, tn), jnp.float32),   # f32 logit accumulator
                pltpu.VMEM((8, tn), jnp.float32),    # per-class ||w||^2 accumulator
            ],
        ),
        compiler_params=pltpu.CompilerParams(
            dimension_semantics=("parallel", "parallel", "arbitrary"),
            vmem_limit_bytes=32 * 1024 * 1024,
        ),
        cost_estimate=pl.CostEstimate(
            flops=2 * batch * cls * emb,
            transcendentals=batch * cls,
            bytes_accessed=(x.size * x.dtype.itemsize
                            + weight.size * weight.dtype.itemsize
                            + batch * cls * x.dtype.itemsize),
        ),
    )(x_p, w_p, lab_p)

    return out_p[:batch, :cls]


def arcface_reference(x, weight, label, s=30.0, m=0.5):
    eps = 1e-12
    xn = x / jnp.maximum(jnp.linalg.norm(x, axis=1, keepdims=True), eps)
    wn = weight / jnp.maximum(jnp.linalg.norm(weight, axis=1, keepdims=True), eps)
    cosine = xn @ wn.T
    sine = jnp.sqrt(jnp.clip(1.0 - cosine ** 2, 0.0, 1.0))
    phi = cosine * math.cos(m) - sine * math.sin(m)
    phi = jnp.where(cosine > math.cos(math.pi - m), phi,
                    cosine - math.sin(math.pi - m) * m)
    one_hot = label[:, None] == jnp.arange(weight.shape[0])[None, :]
    return jnp.where(one_hot, phi, cosine) * s


if __name__ == "__main__":
    embedding_size = 256
    class_num = 384
    batch = 16
    s_, m_ = 30.0, 0.5

    key = jax.random.PRNGKey(0)
    kx, kw, kl = jax.random.split(key, 3)

    x = jax.random.normal(kx, (batch, embedding_size), dtype=jnp.float32)
    # xavier_uniform init like the PyTorch module
    bound = math.sqrt(6.0 / (embedding_size + class_num))
    weight = jax.random.uniform(kw, (class_num, embedding_size),
                                dtype=jnp.float32, minval=-bound, maxval=bound)
    label = jax.random.randint(kl, (batch,), 0, class_num, dtype=jnp.int32)

    # Small tiles so the demo exercises a real (2, 3, 2) grid with k-accumulation.
    out = arcface_forward(x, weight, label, s=s_, m=m_, tm=8, tn=128, tk=128)
    out = jax.block_until_ready(out)

    ref = arcface_reference(x, weight, label, s=s_, m=m_)
    assert out.shape == (batch, class_num)
    assert jnp.allclose(out, ref, atol=2e-2, rtol=1e-3), \
        float(jnp.max(jnp.abs(out - ref)))

    print("KERNEL_OK")
</pallas_src>

<mosaic_0001>
module attributes {stable_mosaic.version = 11 : i64} {
  func.func @_arcface_kernel(%arg0: i32, %arg1: i32, %arg2: i32, %arg3: memref<8x128xf32, #tpu.memory_space<vmem>>, %arg4: memref<128x128xf32, #tpu.memory_space<vmem>>, %arg5: memref<8x1xi32, #tpu.memory_space<vmem>>, %arg6: memref<8x128xf32, #tpu.memory_space<vmem>>, %arg7: memref<8x128xf32, #tpu.memory_space<vmem>>, %arg8: memref<8x128xf32, #tpu.memory_space<vmem>>) attributes {dimension_semantics = [#tpu.dimension_semantics<parallel>, #tpu.dimension_semantics<parallel>, #tpu.dimension_semantics<arbitrary>], iteration_bounds = array<i64: 2, 3, 2>, scalar_prefetch = 0 : i64, scratch_operands = 2 : i64, tpu.core_type = #tpu.core_type<tc>, window_params = [{transform_indices = @transform_0, window_bounds = array<i64: 8, 128>}, {transform_indices = @transform_1, window_bounds = array<i64: 128, 128>}, {transform_indices = @transform_2, window_bounds = array<i64: 8, 1>}, {transform_indices = @transform_3, window_bounds = array<i64: 8, 128>}]} {
    %c0_i32 = arith.constant 0 : i32
    %0 = arith.cmpi eq, %arg2, %c0_i32 : i32
    %1 = arith.extui %0 : i1 to i32
    %c0_i32_0 = arith.constant 0 : i32
    %2 = arith.cmpi ne, %1, %c0_i32_0 : i32
    scf.if %2 {
      %cst_15 = arith.constant 0.000000e+00 : f32
      %18 = vector.broadcast %cst_15 : f32 to vector<8x128xf32>
      %c0_16 = arith.constant 0 : index
      %c0_17 = arith.constant 0 : index
      %19 = vector.load %arg7[%c0_16, %c0_17] : memref<8x128xf32, #tpu.memory_space<vmem>>, vector<8x128xf32>
      tpu.vector_store %arg7[%c0_16, %c0_17], %18 {strides = array<i32>} : memref<8x128xf32, #tpu.memory_space<vmem>>, vector<8x128xf32>,
      %cst_18 = arith.constant 0.000000e+00 : f32
      %20 = vector.broadcast %cst_18 : f32 to vector<8x128xf32>
      %c0_19 = arith.constant 0 : index
      %c0_20 = arith.constant 0 : index
      %21 = vector.load %arg8[%c0_19, %c0_20] : memref<8x128xf32, #tpu.memory_space<vmem>>, vector<8x128xf32>
      tpu.vector_store %arg8[%c0_19, %c0_20], %20 {strides = array<i32>} : memref<8x128xf32, #tpu.memory_space<vmem>>, vector<8x128xf32>,
    } else {
    }
    %c0 = arith.constant 0 : index
    %c0_1 = arith.constant 0 : index
    %3 = vector.load %arg3[%c0, %c0_1] : memref<8x128xf32, #tpu.memory_space<vmem>>, vector<8x128xf32>
    %c0_2 = arith.constant 0 : index
    %c0_3 = arith.constant 0 : index
    %4 = vector.load %arg4[%c0_2, %c0_3] : memref<128x128xf32, #tpu.memory_space<vmem>>, vector<128x128xf32>
    %c0_4 = arith.constant 0 : index
    %c0_5 = arith.constant 0 : index
    %5 = vector.load %arg7[%c0_4, %c0_5] : memref<8x128xf32, #tpu.memory_space<vmem>>, vector<8x128xf32>
    %cst = arith.constant dense<0.000000e+00> : vector<8x128xf32>
    %6 = tpu.matmul %3, %4, %cst {dimension_numbers = #tpu.dot_dimension_numbers<[1], [1], [0], [0], [0, 0, 1, 0], [], []>} : vector<8x128xf32>, vector<128x128xf32>, vector<8x128xf32> -> vector<8x128xf32>
    %7 = arith.addf %5, %6 : vector<8x128xf32>
    %c0_6 = arith.constant 0 : index
    %c0_7 = arith.constant 0 : index
    %8 = vector.load %arg7[%c0_6, %c0_7] : memref<8x128xf32, #tpu.memory_space<vmem>>, vector<8x128xf32>
    tpu.vector_store %arg7[%c0_6, %c0_7], %7 {strides = array<i32>} : memref<8x128xf32, #tpu.memory_space<vmem>>, vector<8x128xf32>,
    %cst_8 = arith.constant 1.000000e+00 : f32
    %9 = vector.broadcast %cst_8 : f32 to vector<8x128xf32>
    %c0_9 = arith.constant 0 : index
    %c0_10 = arith.constant 0 : index
    %10 = vector.load %arg8[%c0_9, %c0_10] : memref<8x128xf32, #tpu.memory_space<vmem>>, vector<8x128xf32>
    %11 = arith.mulf %4, %4 : vector<128x128xf32>
    %cst_11 = arith.constant dense<0.000000e+00> : vector<8x128xf32>
    %12 = tpu.matmul %9, %11, %cst_11 {dimension_numbers = #tpu.dot_dimension_numbers<[1], [1], [0], [0], [0, 0, 1, 0], [], []>} : vector<8x128xf32>, vector<128x128xf32>, vector<8x128xf32> -> vector<8x128xf32>
    %13 = arith.addf %10, %12 : vector<8x128xf32>
    %c0_12 = arith.constant 0 : index
    %c0_13 = arith.constant 0 : index
    %14 = vector.load %arg8[%c0_12, %c0_13] : memref<8x128xf32, #tpu.memory_space<vmem>>, vector<8x128xf32>
    tpu.vector_store %arg8[%c0_12, %c0_13], %13 {strides = array<i32>} : memref<8x128xf32, #tpu.memory_space<vmem>>, vector<8x128xf32>,
    %c1_i32 = arith.constant 1 : i32
    %15 = arith.cmpi eq, %arg2, %c1_i32 : i32
    %16 = arith.extui %15 : i1 to i32
    %c0_i32_14 = arith.constant 0 : i32
    %17 = arith.cmpi ne, %16, %c0_i32_14 : i32
    scf.if %17 {
      %c0_15 = arith.constant 0 : index
      %c0_16 = arith.constant 0 : index
      %18 = vector.load %arg8[%c0_15, %c0_16] : memref<8x128xf32, #tpu.memory_space<vmem>>, vector<1x128xf32>
      %cst_17 = arith.constant 1.000000e-24 : f32
      %19 = vector.broadcast %cst_17 : f32 to vector<1x128xf32>
      %20 = arith.maximumf %18, %19 : vector<1x128xf32>
      %21 = math.rsqrt %20 : vector<1x128xf32>
      %c0_18 = arith.constant 0 : index
      %c0_19 = arith.constant 0 : index
      %22 = vector.load %arg7[%c0_18, %c0_19] : memref<8x128xf32, #tpu.memory_space<vmem>>, vector<8x128xf32>
      %23 = vector.broadcast %21 : vector<1x128xf32> to vector<8x128xf32>
      %24 = arith.mulf %22, %23 : vector<8x128xf32>
      %25 = arith.mulf %24, %24 : vector<8x128xf32>
      %cst_20 = arith.constant 1.000000e+00 : f32
      %26 = vector.broadcast %cst_20 : f32 to vector<8x128xf32>
      %27 = arith.subf %26, %25 : vector<8x128xf32>
      %cst_21 = arith.constant 0.000000e+00 : f32
      %cst_22 = arith.constant 1.000000e+00 : f32
      %28 = vector.broadcast %cst_21 : f32 to vector<8x128xf32>
      %29 = arith.maximumf %28, %27 : vector<8x128xf32>
      %30 = vector.broadcast %cst_22 : f32 to vector<8x128xf32>
      %31 = arith.minimumf %30, %29 : vector<8x128xf32>
      %32 = math.sqrt %31 : vector<8x128xf32>
      %cst_23 = arith.constant 0.87758255 : f32
      %33 = vector.broadcast %cst_23 : f32 to vector<8x128xf32>
      %34 = arith.mulf %24, %33 : vector<8x128xf32>
      %cst_24 = arith.constant 0.47942555 : f32
      %35 = vector.broadcast %cst_24 : f32 to vector<8x128xf32>
      %36 = arith.mulf %32, %35 : vector<8x128xf32>
      %37 = arith.subf %34, %36 : vector<8x128xf32>
      %cst_25 = arith.constant -0.87758255 : f32
      %38 = vector.broadcast %cst_25 : f32 to vector<8x128xf32>
      %39 = arith.cmpf ogt, %24, %38 : vector<8x128xf32>
      %cst_26 = arith.constant 0.239712775 : f32
      %40 = vector.broadcast %cst_26 : f32 to vector<8x128xf32>
      %41 = arith.subf %24, %40 : vector<8x128xf32>
      %42 = arith.select %39, %37, %41 : vector<8x128xi1>, vector<8x128xf32>
      %43 = tpu.iota {dimensions = array<i32: 1>} : vector<8x128xi32>
      %c128_i32 = arith.constant 128 : i32
      %44 = arith.muli %arg1, %c128_i32 : i32
      %45 = vector.broadcast %44 : i32 to vector<8x128xi32>
      %46 = arith.addi %43, %45 : vector<8x128xi32>
      %c0_27 = arith.constant 0 : index
      %c0_28 = arith.constant 0 : index
      %47 = vector.load %arg5[%c0_27, %c0_28] : memref<8x1xi32, #tpu.memory_space<vmem>>, vector<8x1xi32>
      %48 = vector.broadcast %47 : vector<8x1xi32> to vector<8x128xi32>
      %49 = arith.cmpi eq, %46, %48 : vector<8x128xi32>
      %50 = arith.select %49, %42, %24 : vector<8x128xi1>, vector<8x128xf32>
      %cst_29 = arith.constant 3.000000e+01 : f32
      %51 = vector.broadcast %cst_29 : f32 to vector<8x128xf32>
      %52 = arith.mulf %50, %51 : vector<8x128xf32>
      %c0_30 = arith.constant 0 : index
      %c0_31 = arith.constant 0 : index
      %53 = vector.load %arg6[%c0_30, %c0_31] : memref<8x128xf32, #tpu.memory_space<vmem>>, vector<8x128xf32>
      tpu.vector_store %arg6[%c0_30, %c0_31], %52 {strides = array<i32>} : memref<8x128xf32, #tpu.memory_space<vmem>>, vector<8x128xf32>,
    } else {
    }
    return
  }
  func.func @transform_0(%arg0: i32, %arg1: i32, %arg2: i32) -> (i32, i32) {
    %c0_i32 = arith.constant 0 : i32
    return %arg0, %arg2 : i32, i32
  }
  func.func @transform_1(%arg0: i32, %arg1: i32, %arg2: i32) -> (i32, i32) {
    %c0_i32 = arith.constant 0 : i32
    return %arg1, %arg2 : i32, i32
  }
  func.func @transform_2(%arg0: i32, %arg1: i32, %arg2: i32) -> (i32, i32) {
    %c0_i32 = arith.constant 0 : i32
    %c0_i32_0 = arith.constant 0 : i32
    return %arg0, %c0_i32 : i32, i32
  }
  func.func @transform_3(%arg0: i32, %arg1: i32, %arg2: i32) -> (i32, i32) {
    %c0_i32 = arith.constant 0 : i32
    return %arg0, %arg1 : i32, i32
  }
}

</mosaic_0001>

<bundles_post_ra>
// kernel: tpu_custom_call.1
= control target key start
LH: loop header
LB: loop body
LE: loop exit
PB: predicated region body
PF: predicated region fallthrough
CT: control target
= control target key end

     0   :  { %s1663_s0 = inlined_call_operand.hbm [shape: f32[16,256], index: 0, kind: input, shape index: {}]   ;;  %s1664_s1 = inlined_call_operand.hbm [shape: f32[384,256], index: 1, kind: input, shape index: {}]   ;;  %s1665_s2 = inlined_call_operand.vmem [shape: s32[16,1], index: 2, kind: input, shape index: {}]   ;;  %s1666_s3 = inlined_call_operand.hbm [shape: f32[16,384], index: 3, kind: output, shape index: {}]  }
   0x1   :  { %1679 = sst [smem:[#allocation22_spill]] %s1663_s0 }
   0x2   :  { %1680 = sst [smem:[#allocation23_spill]] %s1666_s3 }
   0x3   :  { %8 = vsyncpa [#allocation5], 0 }
   0x4   :  { %10 = vsyncpa [#allocation5 + $0x1], 0 }
   0x5   :  { %11 = vsyncpa [#allocation8], 0 }
   0x6   :  { %13 = vsyncpa [#allocation8 + $0x1], 0 }
   0x7   :  { %14 = vsyncpa [#allocation6], 0 }
   0x8   :  { %16 = vsyncpa [#allocation6 + $0x1], 0  ;;  %s1244_s12 = smov 0   ;;  %s1246_s13 = smov 0  }
   0x9   :  { %s1248_s14 = smov 0   ;;  %s1250_s15 = smov 0  }
   0xa   :  { %s1252_s16 = smov 0   ;;  %s1254_s17 = smov 0  }
   0xb   :  { %s1256_s18 = smov 0   ;;  %s1258_s19 = smov 0  }
   0xc   :  { %s1260_s20 = smov 0   ;;  %s1262_s21 = smov 0  }
   0xd   :  { %s1264_s22 = smov 0   ;;  %s1266_s23 = smov 0  }
   0xe   :  { %s1268_s24 = smov 0   ;;  %s1270_s25 = smov 0  }
   0xf   :  { %s1272_s26 = smov 0   ;;  %s1274_s27 = smov 0  }
  0x10 LB: > { %1681 = sst [smem:[#allocation13_spill]] %s1150_s12  ;;  %s1667_s28 = sadd.s32 4294967295, %s1210_s27   ;;  %s1210_s27 = sphi %s1274_s27, %s22_s27   ;;  %s1206_s26 = sphi %s1272_s26, %s1733_s26   ;;  %s1202_s25 = sphi %s1270_s25, %s1732_s25   ;;  %s1198_s24 = sphi %s1268_s24, %s1731_s24   ;;  %s1194_s23 = sphi %s1266_s23, %s1730_s23   ;;  %s1190_s22 = sphi %s1264_s22, %s1729_s22   ;;  %s1186_s21 = sphi %s1262_s21, %s1728_s21   ;;  %s1182_s20 = sphi %s1260_s20, %s1727_s20   ;;  %s1178_s19 = sphi %s1258_s19, %s1726_s19   ;;  %s1174_s18 = sphi %s1256_s18, %s1725_s18   ;;  %s1170_s17 = sphi %s1254_s17, %s1724_s17   ;;  %s1166_s16 = sphi %s1252_s16, %s1723_s16   ;;  %s1162_s15 = sphi %s1250_s15, %s1722_s15   ;;  %s1158_s14 = sphi %s1248_s14, %s1714_s14   ;;  %s1154_s13 = sphi %s1246_s13, %s1721_s13   ;;  %s1150_s12 = sphi %s1244_s12, %s1720_s12  }
  0x11   : > { %1682 = sst [smem:[#allocation14_spill]] %s1158_s14  ;;  %s34_s30 = sadd.s32 1, %s1198_s24 }
  0x12   : > { %s37_s4 = sadd.s32 1, %s1202_s25  ;;  %p35_p0 = scmp.ge.s32.totalorder %s34_s30, 2 }
  0x13   : > { %s41_s5 = sadd.s32 1, %s1206_s26  ;;  %s50_s6 = sadd.s32 1, %s1182_s20 }
  0x14   : > { %p57_p1 = scmp.ne.s32.totalorder %s1182_s20, %s1178_s19  ;;  %s1735_s30 = smov (%p35_p0, %s34_s30), 0 }
  0x15   : > { %1683 = sst [smem:[#allocation15_spill]] %s1735_s30  ;;  %s1737_s4 = smov (!%p35_p0, %s37_s4), %s1202_s25 }
  0x16   : > { %s46_s7 = ssub.s32 %s1198_s24, %s1735_s30  ;;  %p58_p2 = scmp.eq.s32.totalorder %s1210_s27, 0 }
  0x17   : > { %p39_p3 = scmp.ge.s32.totalorder %s1737_s4, 3  ;;  %p63_p4 = scmp.ne.s32.totalorder %s1178_s19, %s1174_s18 }
  0x18   : > { %p1339_p5 = por %p58_p2, %p57_p1  ;;  %p1345_p6 = scmp.eq.s32.totalorder %s1667_s28, 0 }
  0x19   : > { %s1739_s4 = smov (%p39_p3, %s1737_s4), 0  ;;  %s1741_s5 = smov (!%p39_p3, %s41_s5), %s1206_s26 }
  0x1a   : > { %1686 = sst [smem:[#allocation16_spill]] %s1739_s4  ;;  %p1354_p7 = por %p1345_p6, %p63_p4 }
  0x1b   : > { %s73_s11 = ssub.s32 %s1202_s25, %s1739_s4  ;;  %p43_p8 = scmp.ge.s32.totalorder %s1741_s5, 2 }
  0x1c   : > { %s1687_s10 = scalar_select %p1354_p7, 1, 0 }
  0x1d   : > { %s75_s18 = sor.u32 %s73_s11, %s46_s7  ;;  %s78_s29 = sadd.s32 1, %s1170_s17 }
  0x1e   : > { %p76_p9 = scmp.eq.s32.totalorder %s75_s18, 0  ;;  %s1743_s5 = smov (%p43_p8, %s1741_s5), 0 }
  0x1f   : > { %1688 = sst [smem:[#allocation17_spill]] %s1743_s5  ;;  %s45_s30 = ssub.s32 %s1206_s26, %s1743_s5 }
  0x20   : > { %s1364_s28 = scalar_select %p76_p9, %s1170_s17, %s78_s29  }
  0x21   : > { %p85_p10 = scmp.ne.s32.totalorder %s1170_s17, %s1166_s16  ;;  %s47_s4 = sor.u32 %s46_s7, %s45_s30 }
  0x22   : > { %1689 = sst [smem:[#allocation18_spill]] %s1364_s28  ;;  %p91_p11 = scmp.ne.s32.totalorder %s1166_s16, %s1162_s15 }
  0x23   : > { %p48_p12 = scmp.eq.s32.totalorder %s47_s4, 0  ;;  %p1374_p13 = por %p85_p10, %p58_p2 }
  0x24   : > { %p1380_p0 = por %p91_p11, %p1345_p6  ;;  %s129_s5 = sor.u32 %s73_s11, %s45_s30 }
  0x25   : > { %s1385_s28 = scalar_select %p48_p12, %s1182_s20, %s50_s6  }
  0x26   : > { %s1691_s29 = scalar_select %p1380_p0, 1, 0 }
  0x27   : > { %1692 = sst [smem:[#allocation19_spill]] %s1385_s28  ;;  %p130_p1 = scmp.eq.s32.totalorder %s129_s5, 0 }
  0x28   : > { %s132_s7 = sadd.s32 1, %s1158_s14  ;;  %p142_p3 = scmp.ne.s32.totalorder %s1158_s14, %s1154_s13 }
  0x29   : > { %s1693_s15 = sadd.s32 4294967295, %s1210_s27   ;;  %p148_p6 = scmp.ne.s32.totalorder %s1154_s13, %s1150_s12 }
  0x2a   : > { %p143_p4 = scmp.eq.s32.totalorder %s1693_s15, 11  ;;  %s1697_s3 = sadd.s32 4294967294, %s1210_s27  }
  0x2b   : > { %s1393_s4 = scalar_select %p130_p1, %s1158_s14, %s132_s7  }
  0x2c   : > { %p1395_p2 = por %p143_p4, %p142_p3  ;;  %p149_p8 = scmp.eq.s32.totalorder %s1697_s3, 11 }
  0x2d   : > { %1694 = sst [smem:[#allocation20_spill]] %s1393_s4  ;;  %p840_p9 = scmp.lt.s32.totalorder %s1210_s27, 12 }
  0x2e   : > { %s1695_s9 = scalar_select %p1395_p2, 1, 0 }
  0x2f   : > { %s169_s30 = sand.u32 1, %s1182_s20   ;;  %p1405_p10 = por %p149_p8, %p148_p6 }
  0x30   : > { %1696 = sst [smem:[#allocation21_spill]] %s1695_s9  ;;  %s649_s6 = sshll.u32 %s169_s30, 3 }
  0x31   : > { %s1698_s5 = scalar_select %p1405_p10, 1, 0 }
  0x32   : > { %s650_s11 = sshll.u32 %s1206_s26, 1  ;;  %s173_s28 = scalar_lea.vmem [#allocation4], %s649_s6 }
  0x33   : > { %s178_s7 = sadd.s32 %s1198_s24, %s650_s11  ;;  %s182_s4 = sshll.u32 %s173_s28, 4  ;;  %s1416_s4 = int_to_ptr.vmem [resolvable:$true] %s182_s4 }
  0x34   : > { %s651_s15 = sshll.u32 %s178_s7, 7  ;;  %s1699_s0 = sld [smem:[#allocation22_spill]] }
  0x35   : > { %p1422_p11 = pnand %p840_p9, %p1339_p5  ;;  %s669_s28 = sshll.u32 %s1202_s25, 5 }
  0x36   : > { %s1428_s6 = sadd.s32 %s1198_s24, %s669_s28  ;;  %p1434_p12 = pnand %p840_p9, %p1374_p13 }
  0x37   : > { %s170_s9 = scalar_lea.sflag [#allocation5], %s169_s30  ;;  %p986_p5 = pneg %p1422_p11 }
  0x3a   : > { %s1414_s12 = scalar_lea.hbm %s1699_s0, %s651_s15  ;;  %s989_s15 = scalar_lea.hbm %s1699_s0, 512 }
  0x3b   : > { %s984_s8 = scalar_lea.hbm %s1414_s12, 128  ;;  %p990_p13 = scmp.lt.u32.totalorder %s1414_s12, %s1699_s0 }
  0x3c   : > { %p985_p3 = scmp.ne.s32.totalorder %s1414_s12, %s984_s8  ;;  %p991_p8 = scmp.lt.u32.totalorder %s989_s15, %s984_s8 }
  0x3d   : > { %p993_p1 = scmp.lt.u32.totalorder %s984_s8, %s1414_s12 }
  0x3e   : > { %p987_p4 = pnand %p986_p5, %p985_p3  ;;  %p992_p9 = por %p991_p8, %p990_p13 }
  0x40   : > { %p988_p6 = pneg %p987_p4  ;;  %p994_p10 = por %p993_p1, %p992_p9 }
  0x42   : > { %p995_p2 = pnand %p994_p10, %p988_p6 }
  0x44   : > { %998 = shalt.err (!%p995_p2)
}
  0x45   : > { %s999_s30 = scalar_lea.vmem %s1416_s4, 128  ;;  %s1212_s11 = smov [#allocation4]  }
  0x46   : > { %p1000_p3 = scmp.ne.s32.totalorder %s1416_s4, %s999_s30  ;;  %s1004_s7 = sshll.u32 %s1212_s11, 4  ;;  %s1005_s7 = int_to_ptr.vmem [resolvable:$false] %s1004_s7 }
  0x47   : > { %s1006_s18 = scalar_lea.vmem %s1005_s7, 256  ;;  %p1007_p7 = scmp.lt.s32.totalorder %s1416_s4, %s1005_s7 }
  0x48   : > { %p1002_p4 = pnand %p1000_p3, %p986_p5  ;;  %p1008_p13 = scmp.lt.s32.totalorder %s1006_s18, %s999_s30 }
  0x4a   : > { %p1003_p0 = pneg %p1002_p4  ;;  %p1009_p8 = por %p1008_p13, %p1007_p7 }
  0x4c   : > { %p1010_p1 = pnand %p1009_p8, %p1003_p0 }
  0x4e   : > { %1013 = shalt.err (!%p1010_p1)
}
  0x4f   : > { %832 = dma.hbm_to_vmem [thread:$0]  (!%p1422_p11), %s1414_s12, 128, %s1416_s4, %s170_s9  }
  0x50   : > { %p217_p2 = scmp.lt.s32.totalorder %s1210_s27, 13  ;;  %s189_s8 = sand.u32 1, %s1170_s17  }
  0x51   : > { %s655_s15 = sshll.u32 %s1428_s6, 7  ;;  %p1702_p10 = scmp.ge.s32.totalorder %s1210_s27, 1 }
  0x52   : > { %s652_s30 = sshll.u32 %s189_s8, 7  ;;  %s1476_s7 = scalar_lea.hbm %s1664_s1, %s655_s15 }
  0x53   : > { %p1469_p5 = pnand %p1702_p10, %p217_p2  ;;  %s193_s18 = scalar_lea.vmem [#allocation7], %s652_s30 }
  0x54   : > { %s202_s12 = sshll.u32 %s193_s18, 4  ;;  %s1480_s4 = scalar_lea.sflag [#allocation8], %s189_s8  ;;  %s1478_s12 = int_to_ptr.vmem [resolvable:$true] %s202_s12 }
  0x55   : > { %s1014_s6 = scalar_lea.hbm %s1476_s7, 2048  ;;  %p1016_p0 = pneg %p1434_p12 }
  0x56   : > { %p1015_p7 = scmp.ne.s32.totalorder %s1476_s7, %s1014_s6  ;;  %s1019_s11 = scalar_lea.hbm %s1664_s1, 12288 }
  0x57   : > { %p1020_p9 = scmp.lt.u32.totalorder %s1476_s7, %s1664_s1  ;;  %p1021_p3 = scmp.lt.u32.totalorder %s1019_s11, %s1014_s6 }
  0x58   : > { %p1017_p11 = pnand %p1016_p0, %p1015_p7  ;;  %p1023_p13 = scmp.lt.u32.totalorder %s1014_s6, %s1476_s7 }
  0x59   : > { %p1022_p4 = por %p1021_p3, %p1020_p9 }
  0x5a   : > { %p1018_p6 = pneg %p1017_p11 }
  0x5b   : > { %p1024_p8 = por %p1023_p13, %p1022_p4 }
  0x5d   : > { %p1025_p1 = pnand %p1024_p8, %p1018_p6 }
  0x5f   : > { %1028 = shalt.err (!%p1025_p1)
}
  0x60   : > { %s1029_s8 = scalar_lea.vmem %s1478_s12, 2048  ;;  %s1213_s30 = smov [#allocation7]  }
  0x61   : > { %p1030_p2 = scmp.ne.s32.totalorder %s1478_s12, %s1029_s8  ;;  %s1034_s18 = sshll.u32 %s1213_s30, 4  ;;  %s1035_s18 = int_to_ptr.vmem [resolvable:$false] %s1034_s18 }
  0x62   : > { %s1036_s0 = scalar_lea.vmem %s1035_s18, 4096  ;;  %p1037_p11 = scmp.lt.s32.totalorder %s1478_s12, %s1035_s18 }
  0x63   : > { %p1032_p10 = pnand %p1030_p2, %p1016_p0  ;;  %p1038_p9 = scmp.lt.s32.totalorder %s1036_s0, %s1029_s8 }
  0x65   : > { %p1033_p7 = pneg %p1032_p10  ;;  %p1039_p3 = por %p1038_p9, %p1037_p11 }
  0x67   : > { %p1040_p4 = pnand %p1039_p3, %p1033_p7 }
  0x69   : > { %1043 = shalt.err (!%p1040_p4)
}
  0x6a   : > { %s1214_s6 = smov 256   ;;  %s1215_s9 = smov 128  }
  0x6b   : > { %s1216_s15 = smov 8   ;;  %221 = sbr.rel (%p1469_p5) target bundleno = 495 (0x1ef), region = 32 }
  0x6c   : > { %835 = dma.hbm_to_vmem [thread:$0]  (!%p1434_p12), %s1476_s7, 2048, %s1478_s12, %s1480_s4, %s1214_s6, %s1215_s9, %s1216_s15  }
  0x6d   : > { %s223_s11 = sand.u32 (!%p1469_p5), 1, %s1178_s19   ;;  %p1704_p0 = scmp.ne.s32.totalorder (!%p1469_p5), %s1687_s10, 0 }
  0x6e   : > { %s1511_s3 = sshll.u32 (!%p1469_p5), %s223_s11, 3  ;;  %s224_s8 = scalar_lea.sflag (!%p1469_p5), [#allocation5], %s223_s11 }
  0x6f   : > { %s227_s30 = scalar_lea.vmem (!%p1469_p5), [#allocation4], %s1511_s3 }
  0x72   : > { %1137 = dma.done.wait (%p1704_p0), %s224_s8, 128  }
  0x73   : > { %1139 = vsyncadd (%p1704_p0), %s224_s8, 4294967168  ;;  %s232_s14 = sand.u32 1, %s1166_s16   ;;  %p1705_p12 = scmp.ne.s32.totalorder %s1691_s29, 0 }
  0x74   : > { %s658_s7 = sshll.u32 %s232_s14, 7  ;;  %s233_s12 = scalar_lea.sflag [#allocation8], %s232_s14 }
  0x75   : > { %s1519_s28 = scalar_lea.vmem [#allocation7], %s658_s7 }
  0x76   : > { %1141 = dma.done.wait (%p1705_p12), %s233_s12, 2048  }
  0x77   : > { %1143 = vsyncadd (%p1705_p12), %s233_s12, 4294965248  ;;  %s265_s4 = sand.u32 1, %s1154_s13   ;;  %p269_p5 = scmp.lt.s32.totalorder %s1194_s23, 1 }
  0x78   : > { %s1529_s10 = sshll.u32 %s265_s4, 3  ;;  %p661_p6 = scmp.ne.s32.totalorder %s1186_s21, 0 }
  0x79   : > { %s270_s18 = scalar_select %p269_p5, %s1194_s23, 1 }
  0x7a   : > { %s267_s11 = scalar_lea.vmem [#allocation9], %s1529_s10  ;;  %276 = sbr.rel (%p661_p6) target bundleno = 129 (0x81), region = 44  ;;  %v1217_v0 = vmov (!%p661_p6), 0.0  }
  0x7b   : > { %s660_s0 = sshll.u32 %s270_s18, 3  ;;  %277 = vst [vmem:[#allocation2] sm:$0xff] (!%p661_p6), %v1217_v0  ;;  %278 = vst [vmem:[#allocation3] sm:$0xff] (!%p661_p6), %v1217_v0 }
  0x7c   : > { %s1535_s15 = scalar_lea.vmem %s1665_s2, %s660_s0 }
  0x81 PF: > { %v280_v1 = vld [vmem:[%s1519_s28] sm:$0xff]  ;;  %v281_v2 = vld [vmem:[%s1519_s28 + $0x8] sm:$0xff]  ;;  %v1218_v3 = vmov 0.0|0.0   ;;  %v282_v7 = vld [vmem:[%s1519_s28 + $0x10] sm:$0xff]  ;;  %vm1219_vm0 = vmmov 0   ;;  %v1220_v9 = vmov 0.0  }
  0x82   : > { %774 = vmatprep.subr.bf16.mxu0 %v1218_v3  ;;  %v775_v4 = vpack.c.bf16 %v281_v2, %v280_v1  ;;  %798 = vmatprep.subr.bf16.mxu1 %v1218_v3  ;;  %v370_v5 = vmul.f32 %v280_v1, %v280_v1  ;;  %v371_v6 = vmul.f32 %v281_v2, %v281_v2  ;;  %v283_v8 = vld [vmem:[%s1519_s28 + $0x18] sm:$0xff]  ;;  %v284_v15 = vld [vmem:[%s1519_s28 + $0x20] sm:$0xff]  ;;  %v285_v16 = vld [vmem:[%s1519_s28 + $0x28] sm:$0xff]  ;;  %v1221_v52 = vmov 1.0   ;;  %p662_p13 = scmp.ne.s32.totalorder %s1186_s21, 1 }
  0x83   : > { %736 = vmatprep.mubr.msk.f32.mxu0 %vm1219_vm0, %v1220_v9  ;;  %v372_v11 = vmul.f32 %v282_v7, %v282_v7  ;;  %v373_v12 = vmul.f32 %v283_v8, %v283_v8  ;;  %v778_v13 = vpack.c.bf16 %v283_v8, %v282_v7  ;;  %771 = vmatprep.mubr.msk.f32.mxu1 %vm1219_vm0, %v1220_v9  ;;  %v286_v21 = vld [vmem:[%s1519_s28 + $0x30] sm:$0xff]  ;;  %v287_v22 = vld [vmem:[%s1519_s28 + $0x38] sm:$0xff]  ;;  %v288_v27 = vld [vmem:[%s1519_s28 + $0x40] sm:$0xff]  ;;  %v1222_v62 = vmov (!%p662_p13), 0   ;;  %s664_s21 = sshll.u32 (!%p662_p13), %s1190_s22, 7 }
  0x84   : > { %776 = vmatpush3.bf16.xpose.msra.mxu0 %v775_v4  ;;  %v799_v10 = vpack.c.bf16 %v371_v6, %v370_v5  ;;  %v374_v17 = vmul.f32 %v284_v15, %v284_v15  ;;  %v375_v18 = vmul.f32 %v285_v16, %v285_v16  ;;  %v781_v19 = vpack.c.bf16 %v285_v16, %v284_v15  ;;  %v289_v28 = vld [vmem:[%s1519_s28 + $0x48] sm:$0xff]  ;;  %v290_v33 = vld [vmem:[%s1519_s28 + $0x50] sm:$0xff]  ;;  %v291_v34 = vld [vmem:[%s1519_s28 + $0x58] sm:$0xff] }
  0x85   : > { %777 = vmatprep.subr.bf16.mxu0 %v1218_v3  ;;  %v802_v14 = vpack.c.bf16 %v373_v12, %v372_v11  ;;  %v376_v23 = vmul.f32 %v286_v21, %v286_v21  ;;  %v377_v24 = vmul.f32 %v287_v22, %v287_v22  ;;  %v784_v25 = vpack.c.bf16 %v287_v22, %v286_v21  ;;  %v292_v39 = vld [vmem:[%s1519_s28 + $0x60] sm:$0xff]  ;;  %v293_v40 = vld [vmem:[%s1519_s28 + $0x68] sm:$0xff]  ;;  %v294_v45 = vld [vmem:[%s1519_s28 + $0x70] sm:$0xff] }
  0x86   : > { %800 = vmatpush3.bf16.xpose.msra.mxu1 %v799_v10  ;;  %v805_v20 = vpack.c.bf16 %v375_v18, %v374_v17  ;;  %v378_v29 = vmul.f32 %v288_v27, %v288_v27  ;;  %v379_v30 = vmul.f32 %v289_v28, %v289_v28  ;;  %v787_v31 = vpack.c.bf16 %v289_v28, %v288_v27  ;;  %v295_v46 = vld [vmem:[%s1519_s28 + $0x78] sm:$0xff]  ;;  %v296_v53 = vld [vmem:[#allocation2] sm:$0xff]  ;;  %v369_v55 = vld [vmem:[#allocation3] sm:$0xff] }
  0x87   : > { %801 = vmatprep.subr.bf16.mxu1 %v1218_v3  ;;  %v808_v26 = vpack.c.bf16 %v377_v24, %v376_v23  ;;  %v380_v35 = vmul.f32 %v290_v33, %v290_v33  ;;  %v381_v36 = vmul.f32 %v291_v34, %v291_v34  ;;  %v790_v37 = vpack.c.bf16 %v291_v34, %v290_v33  ;;  %v279_v51 = vld [vmem:[%s227_s30] sm:$0xff]  ;;  %v493_v61 = vld [vmem:[%s1535_s15] sm:$0xff] (!%p662_p13) }
  0x88   : > { %v811_v32 = vpack.c.bf16 %v379_v30, %v378_v29  ;;  %v382_v41 = vmul.f32 %v292_v39, %v292_v39  ;;  %v383_v42 = vmul.f32 %v293_v40, %v293_v40  ;;  %v793_v43 = vpack.c.bf16 %v293_v40, %v292_v39  ;;  %979 = vset.pattern.permute.xlu0 (!%p662_p13), %v1222_v62 }
  0x89   : > { %v814_v38 = vpack.c.bf16 %v381_v36, %v380_v35  ;;  %v384_v47 = vmul.f32 %v294_v45, %v294_v45  ;;  %v385_v48 = vmul.f32 %v295_v46, %v295_v46  ;;  %v796_v49 = vpack.c.bf16 %v295_v46, %v294_v45  ;;  %495 = vperm.xlu0 (!%p662_p13), %979, %v493_v61  }
  0x8a   : > { %v817_v44 = vpack.c.bf16 %v383_v42, %v382_v41  ;;  %v466_v1 = vlaneseq (!%p662_p13) }
  0x8b   : > { %v820_v50 = vpack.c.bf16 %v385_v48, %v384_v47 }
  0x8c   : > { %779 = vmatpush3.bf16.xpose.msra.mxu0 %v778_v13  ;;  %v467_v2 = vshrl.u32 (!%p662_p13), %v466_v1, 7 }
  0x8d   : > { %780 = vmatprep.subr.bf16.mxu0 %v1218_v3 }
  0x8e   : > { %803 = vmatpush3.bf16.xpose.msra.mxu1 %v802_v14 }
  0x8f   : > { %804 = vmatprep.subr.bf16.mxu1 %v1218_v3 }
  0x94   : > { %782 = vmatpush3.bf16.xpose.msra.mxu0 %v781_v19  ;;  %v489_v19 = vand.u32 (!%p662_p13), 127, %v466_v1 }
  0x95   : > { %783 = vmatprep.subr.bf16.mxu0 %v1218_v3 }
  0x96   : > { %806 = vmatpush3.bf16.xpose.msra.mxu1 %v805_v20  ;;  %v491_v20 = vstv (!%p662_p13), %s664_s21 }
  0x97   : > { %807 = vmatprep.subr.bf16.mxu1 %v1218_v3  ;;  %v492_v23 = vadd.s32 (!%p662_p13), %v491_v20, %v489_v19 }
  0x9c   : > { %785 = vmatpush3.bf16.xpose.msra.mxu0 %v784_v25 }
  0x9d   : > { %786 = vmatprep.subr.bf16.mxu0 %v1218_v3 }
  0x9e   : > { %809 = vmatpush3.bf16.xpose.msra.mxu1 %v808_v26 }
  0x9f   : > { %810 = vmatprep.subr.bf16.mxu1 %v1218_v3 }
  0xa4   : > { %788 = vmatpush3.bf16.xpose.msra.mxu0 %v787_v31 }
  0xa5   : > { %789 = vmatprep.subr.bf16.mxu0 %v1218_v3 }
  0xa6   : > { %812 = vmatpush3.bf16.xpose.msra.mxu1 %v811_v32 }
  0xa7   : > { %813 = vmatprep.subr.bf16.mxu1 %v1218_v3 }
  0xac   : > { %791 = vmatpush3.bf16.xpose.msra.mxu0 %v790_v37 }
  0xad   : > { %792 = vmatprep.subr.bf16.mxu0 %v1218_v3 }
  0xae   : > { %815 = vmatpush3.bf16.xpose.msra.mxu1 %v814_v38 }
  0xaf   : > { %816 = vmatprep.subr.bf16.mxu1 %v1218_v3 }
  0xb4   : > { %794 = vmatpush3.bf16.xpose.msra.mxu0 %v793_v43 }
  0xb5   : > { %795 = vmatprep.subr.bf16.mxu0 %v1218_v3 }
  0xb6   : > { %818 = vmatpush3.bf16.xpose.msra.mxu1 %v817_v44 }
  0xb7   : > { %819 = vmatprep.subr.bf16.mxu1 %v1218_v3  ;;  %v468_v3 = vsub.s32 (!%p662_p13), 0, %v467_v2 }
  0xbc   : > { %797 = vmatpush3.bf16.xpose.msra.mxu0 %v796_v49 }
  0xbe   : > { %821 = vmatpush3.bf16.xpose.msra.mxu1 %v820_v50 }
  0xc3   : > { %737 = vmatmul.mubr.f32.vlgmr.msra.gmra.mrb[0].mxu0 %v279_v51 }
  0xc5   : > { %772 = vmatmul.mubr.f32.vlgmr.msra.gmra.mrb[0].mxu1 %v1221_v52 }
 0x108   : > { %v496_v25 = vpop.permute.xlu0 (!%p662_p13), %495 }
 0x109   : > { %vm497_vm4 = vcmp.eq.s32.totalorder (!%p662_p13), %v492_v23, %v496_v25 }
 0x195   : > { %461 = sbr.rel (%p662_p13) target bundleno = 468 (0x1d4), region = 48 }
 0x196   : > { %v363_v54 = vpop.f32.mrb[0].mxu0 }
 0x197   : > { %v367_v56 = vadd.f32 %v363_v54, %v296_v53  ;;  %v738_v57 = vpop.f32.mrb[1].mxu0 }
 0x198   : > { %v452_v58 = vpop.f32.mrb[0].mxu1 }
 0x199   : > { %368 = vst [vmem:[#allocation2] sm:$0xff] %v367_v56  ;;  %v456_v59 = vadd.f32 %v452_v58, %v369_v55  ;;  %v773_v60 = vpop.f32.mrb[1].mxu1 }
 0x19b   : > { %457 = vst [vmem:[#allocation3] sm:$0xff] %v456_v59 }
 0x1a0   : > { %v465_v6 = vld [vmem:[#allocation2] sm:$0xff] }
 0x1a2   : > { %v462_v63 = vld [vmem:[#allocation3] sm:$0x1] }
 0x1a3   : > { %v463_v0 = vmax.f32 %v462_v63, 1e-24 }
 0x1a5   : > { %980 = vrsqrt.f32 %v463_v0 }
 0x1af   : > { %v981_v4 = vpop.eup %980 }
 0x1b0   : > { %v469_v5 = vrot.slane %v981_v4, %v468_v3 }
 0x1b2   : > { %v470_v7 = vmul.f32 %v469_v5, %v465_v6 }
 0x1b4   : > { %v471_v8 = vmul.f32 %v470_v7, %v470_v7  ;;  %v482_v17 = vmul.f32 0.87758255, %v470_v7  ;;  %v663_v22 = vadd.f32 -0.23971277, %v470_v7  ;;  %vm485_vm3 = vcmp.gt.f32.partialorder %v470_v7, -0.87758255 }
 0x1b6   : > { %v472_v9 = vsub.f32 1.0, %v471_v8 }
 0x1b8   : > { %v473_v10 = vmax.f32 %v472_v9, 0.0 }
 0x1ba   : > { %v474_v11 = vmin.f32 %v473_v10, 1.0 }
 0x1bc   : > { %982 = vrsqrt.f32 %v474_v11  ;;  %vm477_vm1 = vcmp.eq.f32.partialorder %v474_v11, inf  ;;  %v480_v14 = vand.u32 2147483648, %v474_v11  ;;  %vm479_vm2 = vcmp.eq.f32.partialorder %v474_v11, 0.0 }
 0x1c6   : > { %v983_v12 = vpop.eup %982 }
 0x1c7   : > { %v476_v13 = vmul.f32 %v983_v12, %v474_v11 }
 0x1c9   : > { %v478_v15 = vsel %vm477_vm1, %v474_v11, %v476_v13 }
 0x1ca   : > { %v481_v16 = vsel %vm479_vm2, %v480_v14, %v478_v15 }
 0x1cb   : > { %v483_v18 = vmul.f32 0.47942555, %v481_v16 }
 0x1cd   : > { %v484_v21 = vsub.f32 %v482_v17, %v483_v18 }
 0x1cf   : > { %v487_v24 = vsel %vm485_vm3, %v484_v21, %v663_v22 }
 0x1d0   : > { %v498_v26 = vsel %vm497_vm4, %v487_v24, %v470_v7 }
 0x1d1   : > { %v499_v27 = vmul.f32 30.0, %v498_v26 }
 0x1d3   : > { %500 = vst [vmem:[%s267_s11] sm:$0xff] %v499_v27 }
 0x1d4 PF: > { %s1706_s29 = sld [smem:[#allocation21_spill]]  ;;  %s822_s3 = smul.u32 3, %s1194_s23 }
 0x1d5   : > { %s517_s8 = sshll.u32 %s267_s11, 4  ;;  %s1707_s28 = sld [smem:[#allocation23_spill]]  ;;  %s1582_s8 = int_to_ptr.vmem [resolvable:$true] %s517_s8 }
 0x1d6   : > { %s513_s30 = sadd.s32 %s1190_s22, %s822_s3  ;;  %s502_s0 = scalar_lea.sflag [#allocation6], %s265_s4 }
 0x1d7   : > { %s666_s14 = sshll.u32 %s513_s30, 7  ;;  %s1044_s6 = scalar_lea.vmem %s1582_s8, 128 }
 0x1d8   : > { %p1045_p8 = scmp.ne.s32.totalorder %s1582_s8, %s1044_s6  ;;  %s1223_s23 = smov [#allocation9]  }
 0x1d9   : > { %s1048_s10 = sshll.u32 %s1223_s23, 4  ;;  %s1049_s10 = int_to_ptr.vmem [resolvable:$false] %s1048_s10 }
 0x1da   : > { %p1708_p1 = scmp.ne.s32.totalorder %s1706_s29, 0  ;;  %s1050_s22 = scalar_lea.vmem %s1049_s10, 256 }
 0x1db   : > { %s515_s18 = scalar_lea.hbm %s1707_s28, %s666_s14  ;;  %p1051_p7 = scmp.lt.s32.totalorder %s1582_s8, %s1049_s10 }
 0x1dc   : > { %p1046_p2 = pnand %p1045_p8, %p1708_p1  ;;  %p1052_p11 = scmp.lt.s32.totalorder %s1050_s22, %s1044_s6 }
 0x1de   : > { %p1047_p10 = pneg %p1046_p2  ;;  %p1053_p9 = por %p1052_p11, %p1051_p7 }
 0x1e0   : > { %p1054_p3 = pnand %p1053_p9, %p1047_p10 }
 0x1e2   : > { %1057 = shalt.err (!%p1054_p3)
}
 0x1e3   : > { %s1058_s9 = scalar_lea.hbm %s515_s18, 128  ;;  %s1062_s11 = scalar_lea.hbm %s1707_s28, 768 }
 0x1e4   : > { %p1059_p4 = scmp.ne.s32.totalorder %s515_s18, %s1058_s9  ;;  %p1063_p5 = scmp.lt.u32.totalorder %s515_s18, %s1707_s28 }
 0x1e5   : > { %p1064_p6 = scmp.lt.u32.totalorder %s1062_s11, %s1058_s9  ;;  %p1066_p8 = scmp.lt.u32.totalorder %s1058_s9, %s515_s18 }
 0x1e6   : > { %p1060_p0 = pnand %p1059_p4, %p1708_p1 }
 0x1e7   : > { %p1065_p13 = por %p1064_p6, %p1063_p5 }
 0x1e8   : > { %p1061_p12 = pneg %p1060_p0 }
 0x1e9   : > { %p1067_p2 = por %p1066_p8, %p1065_p13 }
 0x1eb   : > { %p1068_p10 = pnand %p1067_p2, %p1061_p12 }
 0x1ed   : > { %1071 = shalt.err (!%p1068_p10)
}
 0x1ee   : > { %827 = dma.vmem_to_hbm [thread:$0]  (%p1708_p1), %s1582_s8, 128, %s515_s18, %s502_s0  }
 0x1ef PF: > { %s1709_s30 = sld [smem:[#allocation13_spill]]  ;;  %p841_p7 = scmp.ge.s32.totalorder %s1210_s27, 2 }
 0x1f0   : > { %p1710_p11 = scmp.ne.s32.totalorder %s1698_s5, 0 }
 0x1f2   : > { %p837_p9 = pnand %p841_p7, %p1710_p11 }
 0x1f5   : > { %s529_s14 = sand.u32 1, %s1709_s30  }
 0x1f6   : > { %s530_s7 = scalar_lea.sflag [#allocation6], %s529_s14 }
 0x1f7   : > { %1145 = dma.done.wait (!%p837_p9), %s530_s7, 128  }
 0x1f8   : > { %1147 = vsyncadd (!%p837_p9), %s530_s7, 4294967168  ;;  %s22_s27 = sadd.s32 1, %s1210_s27   ;;  %s1713_s29 = sld [smem:[#allocation14_spill]] }
 0x1f9   : > { %p1610_p3 = scmp.ge.s32.totalorder %s22_s27, 14   ;;  %s1714_s14 = sld [smem:[#allocation20_spill]] }
 0x1fa   : > { %s1715_s8 = sld [smem:[#allocation18_spill]]  ;;  %s1716_s0 = sld [smem:[#allocation19_spill]] }
 0x1fb   : > { %s1717_s5 = sld [smem:[#allocation15_spill]]  ;;  %s1718_s10 = sld [smem:[#allocation16_spill]] }
 0x1fc   : > { %s1719_s9 = sld [smem:[#allocation17_spill]]  ;;  %s1720_s12 = smov %s1154_s13 }
 0x1fd   : > { %s1722_s15 = smov %s1166_s16  ;;  %s1723_s16 = smov %s1170_s17 }
 0x1fe   : > { %s1721_s13 = smov %s1713_s29  ;;  %s1725_s18 = smov %s1178_s19 }
 0x1ff   : > { %s1726_s19 = smov %s1182_s20  ;;  %s1728_s21 = smov %s1198_s24 }
 0x200   : > { %s1724_s17 = smov %s1715_s8  ;;  %s1727_s20 = smov %s1716_s0 }
 0x201   : > { %s1729_s22 = smov %s1202_s25  ;;  %s1730_s23 = smov %s1206_s26 }
 0x202   : > { %s1731_s24 = smov %s1717_s5  ;;  %s1732_s25 = smov %s1718_s10 }
 0x203   : > { %s1733_s26 = smov %s1719_s9  ;;  %21 = sbr.rel (!%p1610_p3) target bundleno = 16 (0x10), region = 101 }
 0x20a   :  { %535 = vsyncpa [#allocation5], 1 }
 0x20b   :  { %537 = vsyncpa [#allocation5 + $0x1], 1 }
 0x20c   :  { %538 = vsyncpa [#allocation8], 1 }
 0x20d   :  { %540 = vsyncpa [#allocation8 + $0x1], 1 }
 0x20e   :  { %541 = vsyncpa [#allocation6], 1 }
 0x20f   :  { %543 = vsyncpa [#allocation6 + $0x1], 1 }

</bundles_post_ra>
